<compile_context>
chip_gen: v7x
topology: tpu7x:2x2x1
jax: 0.10.0
libtpu: 0.0.40
codegen_flags: <defaults>
</compile_context>

<pallas_src>
import jax
import jax.numpy as jnp
from jax.experimental import pallas as pl
from jax.experimental.pallas import tpu as pltpu


def _encoder_kernel(xflat_ref, wih_t_ref, whh_t_ref, b_ref, out_ref):
    """Whole-sequence LSTM encoder in one invocation (everything resident in VMEM).

    xflat_ref : (T*B, D)  t-major flattened input (rows t*B:(t+1)*B = step t)
    wih_t_ref : (D, 4H)   W_ih^T  (f32)
    whh_t_ref : (H, 4H)   W_hh^T  (f32)
    b_ref     : (1, 4H)   b_ih + b_hh (f32)
    out_ref   : (B, T*H)  per-step hidden states, lane-dense, single store
    """
    H = whh_t_ref.shape[0]
    B, TH = out_ref.shape
    T = TH // H

    wih_t = wih_t_ref[...]          # (D, 4H)  loaded once
    whh_t = whh_t_ref[...]          # (H, 4H)  loaded once
    bias = b_ref[...]               # (1, 4H)

    # --- Input projection for ALL time steps, off the recurrent critical path. ---
    gx = jnp.dot(xflat_ref[...].astype(jnp.float32), wih_t,
                 preferred_element_type=jnp.float32) + bias            # (T*B, 4H)

    # --- Recurrence: statically unrolled (T is small & static). -----------------
    h = jnp.zeros((B, H), jnp.float32)
    c = jnp.zeros((B, H), jnp.float32)
    hs = []
    for t in range(T):
        gates = gx[t * B:(t + 1) * B, :] + jnp.dot(
            h, whh_t, preferred_element_type=jnp.float32)              # (B, 4H)

        # Two full-width EUP passes instead of four narrow ones.
        sig = jax.nn.sigmoid(gates)
        tnh = jnp.tanh(gates)

        i_g = sig[:, 0 * H:1 * H]
        f_g = sig[:, 1 * H:2 * H]
        g_g = tnh[:, 2 * H:3 * H]
        o_g = sig[:, 3 * H:4 * H]

        c = f_g * c + i_g * g_g
        h = o_g * jnp.tanh(c)
        hs.append(h)

    # Single lane-dense store of all T hidden states: (B, T*H) = (2, 256).
    out_ref[...] = jnp.concatenate(hs, axis=1).astype(out_ref.dtype)


def prepare_encoder_params(w_ih, w_hh, b_ih, b_hh):
    """One-time canonicalization of torch.nn.LSTM params for the kernel.

    Done outside the per-call jitted forward so no per-call transpose/add ops.
    """
    f32 = jnp.float32
    wih_t = jnp.asarray(w_ih, f32).T                                    # (D, 4H)
    whh_t = jnp.asarray(w_hh, f32).T                                    # (H, 4H)
    bias = (jnp.asarray(b_ih, f32) + jnp.asarray(b_hh, f32)).reshape(1, -1)
    return wih_t, whh_t, bias


@jax.jit
def encoder_forward(x, wih_t, whh_t, bias):
    """x: (B, T, D) batch-first (like the PyTorch module). Returns (x_enc, out)."""
    B, T, D = x.shape
    H = whh_t.shape[0]

    # t-major flatten: free wrapper-side layout plumbing, no in-kernel shuffles.
    x_flat = jnp.transpose(x, (1, 0, 2)).reshape(T * B, D)

    vmem = pl.BlockSpec(memory_space=pltpu.MemorySpace.VMEM)

    out2d = pl.pallas_call(
        _encoder_kernel,
        out_shape=jax.ShapeDtypeStruct((B, T * H), x.dtype),
        in_specs=[vmem, vmem, vmem, vmem],
        out_specs=vmem,
    )(x_flat, wih_t, whh_t, bias)

    out = out2d.reshape(B, T, H)
    # x_enc = last hidden state repeated along the sequence axis (lazy broadcast).
    x_enc = jnp.broadcast_to(out[:, -1:, :], (B, T, H))
    return x_enc, out


def init_lstm_params(key, input_size, hidden_size, dtype=jnp.float32):
    """torch.nn.LSTM-shaped params, uniform(-1/sqrt(H), 1/sqrt(H)) like PyTorch."""
    k = 1.0 / jnp.sqrt(jnp.asarray(hidden_size, jnp.float32))
    k1, k2, k3, k4 = jax.random.split(key, 4)
    w_ih = jax.random.uniform(k1, (4 * hidden_size, input_size), dtype, -k, k)
    w_hh = jax.random.uniform(k2, (4 * hidden_size, hidden_size), dtype, -k, k)
    b_ih = jax.random.uniform(k3, (4 * hidden_size,), dtype, -k, k)
    b_hh = jax.random.uniform(k4, (4 * hidden_size,), dtype, -k, k)
    return w_ih, w_hh, b_ih, b_hh


def _lstm_reference(x, w_ih, w_hh, b_ih, b_hh):
    """Pure-JAX (lax.scan) reference matching torch.nn.LSTM gate order i,f,g,o."""
    B, T, D = x.shape
    H = w_hh.shape[1]

    def step(carry, x_t):
        h, c = carry
        gates = x_t @ w_ih.T + h @ w_hh.T + b_ih + b_hh
        i = jax.nn.sigmoid(gates[:, 0 * H:1 * H])
        f = jax.nn.sigmoid(gates[:, 1 * H:2 * H])
        g = jnp.tanh(gates[:, 2 * H:3 * H])
        o = jax.nn.sigmoid(gates[:, 3 * H:4 * H])
        c = f * c + i * g
        h = o * jnp.tanh(c)
        return (h, c), h

    init = (jnp.zeros((B, H), x.dtype), jnp.zeros((B, H), x.dtype))
    (h_last, _), hs = jax.lax.scan(step, init, jnp.transpose(x, (1, 0, 2)))
    return h_last, jnp.transpose(hs, (1, 0, 2))


if __name__ == "__main__":
    # Module config: Encoder(input_size=4, hidden_size=32, dropout=0.0, seq_len=8)
    B, T, D, H = 2, 8, 4, 32

    key = jax.random.PRNGKey(0)
    kx, kp = jax.random.split(key)
    x = jax.random.normal(kx, (B, T, D), dtype=jnp.float32)       # batch-first input
    w_ih, w_hh, b_ih, b_hh = init_lstm_params(kp, D, H)

    # One-time parameter canonicalization (outside the jitted forward).
    wih_t, whh_t, bias = prepare_encoder_params(w_ih, w_hh, b_ih, b_hh)

    x_enc, out = encoder_forward(x, wih_t, whh_t, bias)
    jax.block_until_ready((x_enc, out))

    assert x_enc.shape == (B, T, H) and out.shape == (B, T, H)

    # Check against a pure-JAX LSTM reference.
    h_last_ref, out_ref_arr = _lstm_reference(x, w_ih, w_hh, b_ih, b_hh)
    assert bool(jnp.allclose(out, out_ref_arr, atol=1e-5, rtol=1e-5))
    assert bool(jnp.allclose(
        x_enc, jnp.broadcast_to(h_last_ref[:, None, :], (B, T, H)),
        atol=1e-5, rtol=1e-5))
    # x_enc is the last hidden state repeated along the sequence axis.
    assert bool(jnp.allclose(x_enc[:, 0, :], out[:, -1, :], atol=1e-6))

    print("KERNEL_OK")
</pallas_src>

<mosaic_0001>
module attributes {stable_mosaic.version = 11 : i64} {
  func.func @_encoder_kernel(%arg0: memref<16x4xf32, #tpu.memory_space<vmem>>, %arg1: memref<4x128xf32, #tpu.memory_space<vmem>>, %arg2: memref<32x128xf32, #tpu.memory_space<vmem>>, %arg3: memref<1x128xf32, #tpu.memory_space<vmem>>, %arg4: memref<2x256xf32, #tpu.memory_space<vmem>>) attributes {dimension_semantics = [], scalar_prefetch = 0 : i64, scratch_operands = 0 : i64, tpu.core_type = #tpu.core_type<tc>} {
    %c0 = arith.constant 0 : index
    %c0_0 = arith.constant 0 : index
    %0 = vector.load %arg1[%c0, %c0_0] : memref<4x128xf32, #tpu.memory_space<vmem>>, vector<4x128xf32>
    %c0_1 = arith.constant 0 : index
    %c0_2 = arith.constant 0 : index
    %1 = vector.load %arg2[%c0_1, %c0_2] : memref<32x128xf32, #tpu.memory_space<vmem>>, vector<32x128xf32>
    %c0_3 = arith.constant 0 : index
    %c0_4 = arith.constant 0 : index
    %2 = vector.load %arg3[%c0_3, %c0_4] : memref<1x128xf32, #tpu.memory_space<vmem>>, vector<1x128xf32>
    %c0_5 = arith.constant 0 : index
    %c0_6 = arith.constant 0 : index
    %3 = vector.load %arg0[%c0_5, %c0_6] : memref<16x4xf32, #tpu.memory_space<vmem>>, vector<16x4xf32>
    %cst = arith.constant dense<0.000000e+00> : vector<16x128xf32>
    %4 = tpu.matmul %3, %0, %cst {dimension_numbers = #tpu.dot_dimension_numbers<[1], [0], [0], [1], [0, 0, 1, 1], [], []>} : vector<16x4xf32>, vector<4x128xf32>, vector<16x128xf32> -> vector<16x128xf32>
    %5 = vector.broadcast %2 : vector<1x128xf32> to vector<16x128xf32>
    %6 = arith.addf %4, %5 : vector<16x128xf32>
    %cst_7 = arith.constant 0.000000e+00 : f32
    %7 = vector.broadcast %cst_7 : f32 to vector<2x32xf32>
    %cst_8 = arith.constant 0.000000e+00 : f32
    %8 = vector.broadcast %cst_8 : f32 to vector<2x32xf32>
    %9 = vector.extract_strided_slice %6 {offsets = [0, 0], sizes = [2, 128], strides = [1, 1]} : vector<16x128xf32> to vector<2x128xf32>
    %cst_9 = arith.constant dense<0.000000e+00> : vector<2x128xf32>
    %10 = tpu.matmul %7, %1, %cst_9 {dimension_numbers = #tpu.dot_dimension_numbers<[1], [0], [0], [1], [0, 0, 1, 1], [], []>} : vector<2x32xf32>, vector<32x128xf32>, vector<2x128xf32> -> vector<2x128xf32>
    %11 = arith.addf %9, %10 : vector<2x128xf32>
    %12 = arith.negf %11 : vector<2x128xf32>
    %13 = math.exp %12 : vector<2x128xf32>
    %cst_10 = arith.constant 1.000000e+00 : f32
    %14 = vector.broadcast %cst_10 : f32 to vector<2x128xf32>
    %15 = arith.addf %14, %13 : vector<2x128xf32>
    %16 = arith.divf %14, %15 : vector<2x128xf32>
    %17 = math.tanh %11 : vector<2x128xf32>
    %18 = vector.extract_strided_slice %16 {offsets = [0, 0], sizes = [2, 32], strides = [1, 1]} : vector<2x128xf32> to vector<2x32xf32>
    %19 = vector.extract_strided_slice %16 {offsets = [0, 32], sizes = [2, 32], strides = [1, 1]} : vector<2x128xf32> to vector<2x32xf32>
    %20 = vector.extract_strided_slice %17 {offsets = [0, 64], sizes = [2, 32], strides = [1, 1]} : vector<2x128xf32> to vector<2x32xf32>
    %21 = vector.extract_strided_slice %16 {offsets = [0, 96], sizes = [2, 32], strides = [1, 1]} : vector<2x128xf32> to vector<2x32xf32>
    %22 = arith.mulf %19, %8 : vector<2x32xf32>
    %23 = arith.mulf %18, %20 : vector<2x32xf32>
    %24 = arith.addf %22, %23 : vector<2x32xf32>
    %25 = math.tanh %24 : vector<2x32xf32>
    %26 = arith.mulf %21, %25 : vector<2x32xf32>
    %27 = vector.extract_strided_slice %6 {offsets = [2, 0], sizes = [2, 128], strides = [1, 1]} : vector<16x128xf32> to vector<2x128xf32>
    %cst_11 = arith.constant dense<0.000000e+00> : vector<2x128xf32>
    %28 = tpu.matmul %26, %1, %cst_11 {dimension_numbers = #tpu.dot_dimension_numbers<[1], [0], [0], [1], [0, 0, 1, 1], [], []>} : vector<2x32xf32>, vector<32x128xf32>, vector<2x128xf32> -> vector<2x128xf32>
    %29 = arith.addf %27, %28 : vector<2x128xf32>
    %30 = arith.negf %29 : vector<2x128xf32>
    %31 = math.exp %30 : vector<2x128xf32>
    %cst_12 = arith.constant 1.000000e+00 : f32
    %32 = vector.broadcast %cst_12 : f32 to vector<2x128xf32>
    %33 = arith.addf %32, %31 : vector<2x128xf32>
    %34 = arith.divf %32, %33 : vector<2x128xf32>
    %35 = math.tanh %29 : vector<2x128xf32>
    %36 = vector.extract_strided_slice %34 {offsets = [0, 0], sizes = [2, 32], strides = [1, 1]} : vector<2x128xf32> to vector<2x32xf32>
    %37 = vector.extract_strided_slice %34 {offsets = [0, 32], sizes = [2, 32], strides = [1, 1]} : vector<2x128xf32> to vector<2x32xf32>
    %38 = vector.extract_strided_slice %35 {offsets = [0, 64], sizes = [2, 32], strides = [1, 1]} : vector<2x128xf32> to vector<2x32xf32>
    %39 = vector.extract_strided_slice %34 {offsets = [0, 96], sizes = [2, 32], strides = [1, 1]} : vector<2x128xf32> to vector<2x32xf32>
    %40 = arith.mulf %37, %24 : vector<2x32xf32>
    %41 = arith.mulf %36, %38 : vector<2x32xf32>
    %42 = arith.addf %40, %41 : vector<2x32xf32>
    %43 = math.tanh %42 : vector<2x32xf32>
    %44 = arith.mulf %39, %43 : vector<2x32xf32>
    %45 = vector.extract_strided_slice %6 {offsets = [4, 0], sizes = [2, 128], strides = [1, 1]} : vector<16x128xf32> to vector<2x128xf32>
    %cst_13 = arith.constant dense<0.000000e+00> : vector<2x128xf32>
    %46 = tpu.matmul %44, %1, %cst_13 {dimension_numbers = #tpu.dot_dimension_numbers<[1], [0], [0], [1], [0, 0, 1, 1], [], []>} : vector<2x32xf32>, vector<32x128xf32>, vector<2x128xf32> -> vector<2x128xf32>
    %47 = arith.addf %45, %46 : vector<2x128xf32>
    %48 = arith.negf %47 : vector<2x128xf32>
    %49 = math.exp %48 : vector<2x128xf32>
    %cst_14 = arith.constant 1.000000e+00 : f32
    %50 = vector.broadcast %cst_14 : f32 to vector<2x128xf32>
    %51 = arith.addf %50, %49 : vector<2x128xf32>
    %52 = arith.divf %50, %51 : vector<2x128xf32>
    %53 = math.tanh %47 : vector<2x128xf32>
    %54 = vector.extract_strided_slice %52 {offsets = [0, 0], sizes = [2, 32], strides = [1, 1]} : vector<2x128xf32> to vector<2x32xf32>
    %55 = vector.extract_strided_slice %52 {offsets = [0, 32], sizes = [2, 32], strides = [1, 1]} : vector<2x128xf32> to vector<2x32xf32>
    %56 = vector.extract_strided_slice %53 {offsets = [0, 64], sizes = [2, 32], strides = [1, 1]} : vector<2x128xf32> to vector<2x32xf32>
    %57 = vector.extract_strided_slice %52 {offsets = [0, 96], sizes = [2, 32], strides = [1, 1]} : vector<2x128xf32> to vector<2x32xf32>
    %58 = arith.mulf %55, %42 : vector<2x32xf32>
    %59 = arith.mulf %54, %56 : vector<2x32xf32>
    %60 = arith.addf %58, %59 : vector<2x32xf32>
    %61 = math.tanh %60 : vector<2x32xf32>
    %62 = arith.mulf %57, %61 : vector<2x32xf32>
    %63 = vector.extract_strided_slice %6 {offsets = [6, 0], sizes = [2, 128], strides = [1, 1]} : vector<16x128xf32> to vector<2x128xf32>
    %cst_15 = arith.constant dense<0.000000e+00> : vector<2x128xf32>
    %64 = tpu.matmul %62, %1, %cst_15 {dimension_numbers = #tpu.dot_dimension_numbers<[1], [0], [0], [1], [0, 0, 1, 1], [], []>} : vector<2x32xf32>, vector<32x128xf32>, vector<2x128xf32> -> vector<2x128xf32>
    %65 = arith.addf %63, %64 : vector<2x128xf32>
    %66 = arith.negf %65 : vector<2x128xf32>
    %67 = math.exp %66 : vector<2x128xf32>
    %cst_16 = arith.constant 1.000000e+00 : f32
    %68 = vector.broadcast %cst_16 : f32 to vector<2x128xf32>
    %69 = arith.addf %68, %67 : vector<2x128xf32>
    %70 = arith.divf %68, %69 : vector<2x128xf32>
    %71 = math.tanh %65 : vector<2x128xf32>
    %72 = vector.extract_strided_slice %70 {offsets = [0, 0], sizes = [2, 32], strides = [1, 1]} : vector<2x128xf32> to vector<2x32xf32>
    %73 = vector.extract_strided_slice %70 {offsets = [0, 32], sizes = [2, 32], strides = [1, 1]} : vector<2x128xf32> to vector<2x32xf32>
    %74 = vector.extract_strided_slice %71 {offsets = [0, 64], sizes = [2, 32], strides = [1, 1]} : vector<2x128xf32> to vector<2x32xf32>
    %75 = vector.extract_strided_slice %70 {offsets = [0, 96], sizes = [2, 32], strides = [1, 1]} : vector<2x128xf32> to vector<2x32xf32>
    %76 = arith.mulf %73, %60 : vector<2x32xf32>
    %77 = arith.mulf %72, %74 : vector<2x32xf32>
    %78 = arith.addf %76, %77 : vector<2x32xf32>
    %79 = math.tanh %78 : vector<2x32xf32>
    %80 = arith.mulf %75, %79 : vector<2x32xf32>
    %81 = vector.extract_strided_slice %6 {offsets = [8, 0], sizes = [2, 128], strides = [1, 1]} : vector<16x128xf32> to vector<2x128xf32>
    %cst_17 = arith.constant dense<0.000000e+00> : vector<2x128xf32>
    %82 = tpu.matmul %80, %1, %cst_17 {dimension_numbers = #tpu.dot_dimension_numbers<[1], [0], [0], [1], [0, 0, 1, 1], [], []>} : vector<2x32xf32>, vector<32x128xf32>, vector<2x128xf32> -> vector<2x128xf32>
    %83 = arith.addf %81, %82 : vector<2x128xf32>
    %84 = arith.negf %83 : vector<2x128xf32>
    %85 = math.exp %84 : vector<2x128xf32>
    %cst_18 = arith.constant 1.000000e+00 : f32
    %86 = vector.broadcast %cst_18 : f32 to vector<2x128xf32>
    %87 = arith.addf %86, %85 : vector<2x128xf32>
    %88 = arith.divf %86, %87 : vector<2x128xf32>
    %89 = math.tanh %83 : vector<2x128xf32>
    %90 = vector.extract_strided_slice %88 {offsets = [0, 0], sizes = [2, 32], strides = [1, 1]} : vector<2x128xf32> to vector<2x32xf32>
    %91 = vector.extract_strided_slice %88 {offsets = [0, 32], sizes = [2, 32], strides = [1, 1]} : vector<2x128xf32> to vector<2x32xf32>
    %92 = vector.extract_strided_slice %89 {offsets = [0, 64], sizes = [2, 32], strides = [1, 1]} : vector<2x128xf32> to vector<2x32xf32>
    %93 = vector.extract_strided_slice %88 {offsets = [0, 96], sizes = [2, 32], strides = [1, 1]} : vector<2x128xf32> to vector<2x32xf32>
    %94 = arith.mulf %91, %78 : vector<2x32xf32>
    %95 = arith.mulf %90, %92 : vector<2x32xf32>
    %96 = arith.addf %94, %95 : vector<2x32xf32>
    %97 = math.tanh %96 : vector<2x32xf32>
    %98 = arith.mulf %93, %97 : vector<2x32xf32>
    %99 = vector.extract_strided_slice %6 {offsets = [10, 0], sizes = [2, 128], strides = [1, 1]} : vector<16x128xf32> to vector<2x128xf32>
    %cst_19 = arith.constant dense<0.000000e+00> : vector<2x128xf32>
    %100 = tpu.matmul %98, %1, %cst_19 {dimension_numbers = #tpu.dot_dimension_numbers<[1], [0], [0], [1], [0, 0, 1, 1], [], []>} : vector<2x32xf32>, vector<32x128xf32>, vector<2x128xf32> -> vector<2x128xf32>
    %101 = arith.addf %99, %100 : vector<2x128xf32>
    %102 = arith.negf %101 : vector<2x128xf32>
    %103 = math.exp %102 : vector<2x128xf32>
    %cst_20 = arith.constant 1.000000e+00 : f32
    %104 = vector.broadcast %cst_20 : f32 to vector<2x128xf32>
    %105 = arith.addf %104, %103 : vector<2x128xf32>
    %106 = arith.divf %104, %105 : vector<2x128xf32>
    %107 = math.tanh %101 : vector<2x128xf32>
    %108 = vector.extract_strided_slice %106 {offsets = [0, 0], sizes = [2, 32], strides = [1, 1]} : vector<2x128xf32> to vector<2x32xf32>
    %109 = vector.extract_strided_slice %106 {offsets = [0, 32], sizes = [2, 32], strides = [1, 1]} : vector<2x128xf32> to vector<2x32xf32>
    %110 = vector.extract_strided_slice %107 {offsets = [0, 64], sizes = [2, 32], strides = [1, 1]} : vector<2x128xf32> to vector<2x32xf32>
    %111 = vector.extract_strided_slice %106 {offsets = [0, 96], sizes = [2, 32], strides = [1, 1]} : vector<2x128xf32> to vector<2x32xf32>
    %112 = arith.mulf %109, %96 : vector<2x32xf32>
    %113 = arith.mulf %108, %110 : vector<2x32xf32>
    %114 = arith.addf %112, %113 : vector<2x32xf32>
    %115 = math.tanh %114 : vector<2x32xf32>
    %116 = arith.mulf %111, %115 : vector<2x32xf32>
    %117 = vector.extract_strided_slice %6 {offsets = [12, 0], sizes = [2, 128], strides = [1, 1]} : vector<16x128xf32> to vector<2x128xf32>
    %cst_21 = arith.constant dense<0.000000e+00> : vector<2x128xf32>
    %118 = tpu.matmul %116, %1, %cst_21 {dimension_numbers = #tpu.dot_dimension_numbers<[1], [0], [0], [1], [0, 0, 1, 1], [], []>} : vector<2x32xf32>, vector<32x128xf32>, vector<2x128xf32> -> vector<2x128xf32>
    %119 = arith.addf %117, %118 : vector<2x128xf32>
    %120 = arith.negf %119 : vector<2x128xf32>
    %121 = math.exp %120 : vector<2x128xf32>
    %cst_22 = arith.constant 1.000000e+00 : f32
    %122 = vector.broadcast %cst_22 : f32 to vector<2x128xf32>
    %123 = arith.addf %122, %121 : vector<2x128xf32>
    %124 = arith.divf %122, %123 : vector<2x128xf32>
    %125 = math.tanh %119 : vector<2x128xf32>
    %126 = vector.extract_strided_slice %124 {offsets = [0, 0], sizes = [2, 32], strides = [1, 1]} : vector<2x128xf32> to vector<2x32xf32>
    %127 = vector.extract_strided_slice %124 {offsets = [0, 32], sizes = [2, 32], strides = [1, 1]} : vector<2x128xf32> to vector<2x32xf32>
    %128 = vector.extract_strided_slice %125 {offsets = [0, 64], sizes = [2, 32], strides = [1, 1]} : vector<2x128xf32> to vector<2x32xf32>
    %129 = vector.extract_strided_slice %124 {offsets = [0, 96], sizes = [2, 32], strides = [1, 1]} : vector<2x128xf32> to vector<2x32xf32>
    %130 = arith.mulf %127, %114 : vector<2x32xf32>
    %131 = arith.mulf %126, %128 : vector<2x32xf32>
    %132 = arith.addf %130, %131 : vector<2x32xf32>
    %133 = math.tanh %132 : vector<2x32xf32>
    %134 = arith.mulf %129, %133 : vector<2x32xf32>
    %135 = vector.extract_strided_slice %6 {offsets = [14, 0], sizes = [2, 128], strides = [1, 1]} : vector<16x128xf32> to vector<2x128xf32>
    %cst_23 = arith.constant dense<0.000000e+00> : vector<2x128xf32>
    %136 = tpu.matmul %134, %1, %cst_23 {dimension_numbers = #tpu.dot_dimension_numbers<[1], [0], [0], [1], [0, 0, 1, 1], [], []>} : vector<2x32xf32>, vector<32x128xf32>, vector<2x128xf32> -> vector<2x128xf32>
    %137 = arith.addf %135, %136 : vector<2x128xf32>
    %138 = arith.negf %137 : vector<2x128xf32>
    %139 = math.exp %138 : vector<2x128xf32>
    %cst_24 = arith.constant 1.000000e+00 : f32
    %140 = vector.broadcast %cst_24 : f32 to vector<2x128xf32>
    %141 = arith.addf %140, %139 : vector<2x128xf32>
    %142 = arith.divf %140, %141 : vector<2x128xf32>
    %143 = math.tanh %137 : vector<2x128xf32>
    %144 = vector.extract_strided_slice %142 {offsets = [0, 0], sizes = [2, 32], strides = [1, 1]} : vector<2x128xf32> to vector<2x32xf32>
    %145 = vector.extract_strided_slice %142 {offsets = [0, 32], sizes = [2, 32], strides = [1, 1]} : vector<2x128xf32> to vector<2x32xf32>
    %146 = vector.extract_strided_slice %143 {offsets = [0, 64], sizes = [2, 32], strides = [1, 1]} : vector<2x128xf32> to vector<2x32xf32>
    %147 = vector.extract_strided_slice %142 {offsets = [0, 96], sizes = [2, 32], strides = [1, 1]} : vector<2x128xf32> to vector<2x32xf32>
    %148 = arith.mulf %145, %132 : vector<2x32xf32>
    %149 = arith.mulf %144, %146 : vector<2x32xf32>
    %150 = arith.addf %148, %149 : vector<2x32xf32>
    %151 = math.tanh %150 : vector<2x32xf32>
    %152 = arith.mulf %147, %151 : vector<2x32xf32>
    %153 = tpu.concatenate %26, %44, %62, %80, %98, %116, %134, %152 in 1 : vector<2x32xf32>, vector<2x32xf32>, vector<2x32xf32>, vector<2x32xf32>, vector<2x32xf32>, vector<2x32xf32>, vector<2x32xf32>, vector<2x32xf32> -> vector<2x256xf32>
    %c0_25 = arith.constant 0 : index
    %c0_26 = arith.constant 0 : index
    %154 = vector.load %arg4[%c0_25, %c0_26] : memref<2x256xf32, #tpu.memory_space<vmem>>, vector<2x256xf32>
    tpu.vector_store %arg4[%c0_25, %c0_26], %153 {strides = array<i32>} : memref<2x256xf32, #tpu.memory_space<vmem>>, vector<2x256xf32>,
    return
  }
}

</mosaic_0001>

<bundles_post_ra>
// kernel: encoder_forward.1
= control target key start
LH: loop header
LB: loop body
LE: loop exit
PB: predicated region body
PF: predicated region fallthrough
CT: control target
= control target key end

     0   :  { %vm38_vm0 = vcmask 1043456   ;;  %vm31_vm1 = vcmask 31744   ;;  %v1276_v0 = vmov 0.0|0.0   ;;  %vm1277_vm2 = vmmov 0   ;;  %s1279_s28 = smov 64   ;;  %s1281_s29 = smov 96   ;;  %s1474_s2 = inlined_call_operand.vmem [shape: f32[32,128], index: 2, kind: input, shape index: {}]   ;;  %s1475_s1 = inlined_call_operand.vmem [shape: f32[4,128], index: 1, kind: input, shape index: {}]   ;;  %s1476_s0 = inlined_call_operand.vmem [shape: f32[16,4], index: 0, kind: input, shape index: {}]   ;;  %s1477_s3 = inlined_call_operand.vmem [shape: f32[1,128], index: 3, kind: input, shape index: {}]   ;;  %s1478_s4 = inlined_call_operand.vmem [shape: f32[2,256], index: 4, kind: output, shape index: {}]  }
   0x1   :  { %1158 = vmatprep.subr.bf16.mxu1 %v1276_v0  ;;  %v18_v1 = vld [vmem:[%s1474_s2] sm:$0xff]  ;;  %v19_v2 = vld [vmem:[%s1474_s2 + $0x8] sm:$0xff]  ;;  %v20_v7 = vld [vmem:[%s1474_s2 + $0x10] sm:$0xff]  ;;  %v1278_v8 = vmov 0.0   ;;  %vm117_vm3 = vcmask 261120   ;;  %vm979_vm4 = vcmask 523264  }
   0x2   :  { %v17_v3 = vld [vmem:[%s1475_s1] sm:$0xf]  ;;  %v1317_v4 = vpack.c.bf16 %v19_v2, %v18_v1  ;;  %v24_v6 = vld [vmem:[%s1476_s0 + $0x8] sm:$0xff]  ;;  %1078 = vmatprep.mubr.msk.f32.mxu1 %vm1277_vm2, %v1278_v8  ;;  %v21_v9 = vld [vmem:[%s1474_s2 + $0x18] sm:$0xff]  ;;  %vm981_vm5 = vcmask 785408  }
   0x3   :  { %1065 = vmatprep.subr.msk.mxu0 %vm38_vm0, %v17_v3  ;;  %v23_v5 = vld [vmem:[%s1476_s0] sm:$0xff]  ;;  %v1338_v10 = vpack.c.bf16 %v21_v9, %v20_v7 }
   0x4   :  { %1066 = vmatpush3.msk.msra.mxu0 %vm38_vm0, %v17_v3  ;;  %1067 = vmatprep.mubr.msk.f32.mxu0 %vm31_vm1, %v23_v5  ;;  %v1002_v11 = vld [vmem:[%s1477_s3] ss:$0 sm:$0xff]  ;;  %s1280_s3 = smov 32  }
   0x5   :  { %1160 = vmatpush3.bf16.msra.mxu1 %v1317_v4  ;;  %1068 = vmatmul.mubr.msk.f32.vlgmr.msra.gmra.mrb[0].mxu0 %vm31_vm1, %v24_v6 }
   0x6   :  { %1161 = vmatprep.subr.bf16.mxu1 %v1276_v0  ;;  %1164 = vmatprep.subr.bf16.mxu0 %v1276_v0 }
   0x7   :  { %1166 = vmatpush3.bf16.msra.mxu0 %v1317_v4  ;;  %1089 = vmatprep.mubr.msk.f32.mxu0 %vm1277_vm2, %v1278_v8 }
   0x8   :  { %1167 = vmatprep.subr.bf16.mxu0 %v1276_v0 }
   0x9   :  { %1163 = vmatpush3.bf16.msra.mxu1 %v1338_v10 }
   0xa   :  { %1170 = vmatprep.subr.bf16.mxu1 %v1276_v0 }
   0xb   :  { %1169 = vmatpush3.bf16.msra.mxu0 %v1338_v10 }
   0xc   :  { %1079 = vmatmul.mubr.f32.vlgmr.msra.gmra.mrb[0].mxu1 %v1278_v8  ;;  %1176 = vmatprep.subr.bf16.mxu0 %v1276_v0 }
   0xd   :  { %1172 = vmatpush3.bf16.msra.mxu1 %v1317_v4  ;;  %1100 = vmatprep.mubr.msk.f32.mxu1 %vm1277_vm2, %v1278_v8 }
   0xe   :  { %1173 = vmatprep.subr.bf16.mxu1 %v1276_v0 }
  0x11   :  { %1175 = vmatpush3.bf16.msra.mxu1 %v1338_v10 }
  0x12   :  { %1182 = vmatprep.subr.bf16.mxu1 %v1276_v0 }
  0xd8   :  { %v1069_v12 = vpop.f32.mrb[0].mxu0 }
  0xd9   :  { %v1360_v13 = vadd.f32 %v1069_v12, %v1002_v11  ;;  %v108_v14 = vpop.f32.mrb[1].mxu0 }
  0xda   :  { %v1362_v15 = vadd.f32 %v1002_v11, %v108_v14 }
  0xdf   :  { %v187_v16 = vpop.f32.mrb[0].mxu1 }
  0xe0   :  { %v191_v17 = vadd.f32 %v187_v16, %v1362_v15  ;;  %v1080_v18 = vpop.f32.mrb[1].mxu1 }
  0xe2   :  { %1212 = vtanh.f32 %v191_v17  ;;  %v1006_v20 = vmul.f32 -1.442695, %v191_v17 }
  0xe4   :  { %1214 = vpow2.f32 %v1006_v20 }
  0xec   :  { %v1213_v19 = vpop.eup %1212 }
  0xed   :  { %201 = vrot.lane.b32.xlu0 %v1213_v19, %s1279_s28 }
  0xee   :  { %v1215_v21 = vpop.eup %1214 }
  0xef   :  { %v195_v22 = vadd.f32 1.0, %v1215_v21 }
  0xf1   :  { %1216 = vrcp.f32 %v195_v22 }
  0xfb   :  { %v1217_v23 = vpop.eup %1216 }
  0xfc   :  { %v199_v26 = vmul.f32 0.0, %v1217_v23 }
 0x15f   :  { %v202_v24 = vpop.permute.xlu0 %201 }
 0x160   :  { %v204_v25 = vmul.f32 %v1217_v23, %v202_v24 }
 0x162   :  { %206 = vrot.lane.b32.xlu0 %v204_v25, %s1280_s3 }
 0x1d4   :  { %v207_v27 = vpop.permute.xlu0 %206 }
 0x1d5   :  { %v209_v28 = vadd.f32 %v207_v27, %v199_v26 }
 0x1d7   :  { %1218 = vtanh.f32 %v209_v28  ;;  %v303_v44 = vrot.slane %v209_v28, 6 }
 0x1e1   :  { %v1219_v29 = vpop.eup %1218 }
 0x1e2   :  { %212 = vrot.lane.b32.xlu1 %v1219_v29, %s1279_s28 }
 0x254   :  { %v213_v30 = vpop.permute.xlu1 %212 }
 0x255   :  { %v215_v31 = vmul.f32 %v1217_v23, %v213_v30 }
 0x257   :  { %217 = vrot.lane.b32.xlu1 %v215_v31, %s1280_s3 }
 0x2c9   :  { %v1369_v32 = vpop.permute.xlu1 %217 }
 0x2ca   :  { %1090 = vmatmul.mubr.msk.f32.vlgmr.msra.gmra.mrb[2].mxu0 %vm117_vm3, %v1369_v32 }
 0x2cb   :  { %1178 = vmatpush3.bf16.msra.mxu0 %v1317_v4  ;;  %1111 = vmatprep.mubr.msk.f32.mxu0 %vm1277_vm2, %v1278_v8 }
 0x2cc   :  { %1179 = vmatprep.subr.bf16.mxu0 %v1276_v0 }
 0x2cf   :  { %1181 = vmatpush3.bf16.msra.mxu0 %v1338_v10 }
 0x2d0   :  { %1188 = vmatprep.subr.bf16.mxu0 %v1276_v0 }
 0x39d   :  { %v287_v33 = vpop.f32.mrb[2].mxu0 }
 0x39e   :  { %v292_v34 = vrot.slane %v287_v33, 6  ;;  %v1091_v35 = vpop.f32.mrb[3].mxu0 }
 0x3a0   :  { %v294_v36 = vadd.f32 %v292_v34, %v1362_v15 }
 0x3a2   :  { %1220 = vtanh.f32 %v294_v36  ;;  %v1008_v38 = vmul.f32 -1.442695, %v294_v36 }
 0x3a4   :  { %1222 = vpow2.f32 %v1008_v38 }
 0x3ac   :  { %v1221_v37 = vpop.eup %1220 }
 0x3ad   :  { %307 = vrot.lane.b32.xlu0 %v1221_v37, %s1279_s28 }
 0x3ae   :  { %v1223_v39 = vpop.eup %1222 }
 0x3af   :  { %v298_v40 = vadd.f32 1.0, %v1223_v39 }
 0x3b1   :  { %1224 = vrcp.f32 %v298_v40 }
 0x3bb   :  { %v1225_v41 = vpop.eup %1224 }
 0x3bc   :  { %v305_v45 = vmul.f32 %v1225_v41, %v303_v44 }
 0x41f   :  { %v308_v42 = vpop.permute.xlu0 %307 }
 0x420   :  { %v310_v43 = vmul.f32 %v1225_v41, %v308_v42 }
 0x422   :  { %312 = vrot.lane.b32.xlu1 %v310_v43, %s1280_s3 }
 0x494   :  { %v313_v46 = vpop.permute.xlu1 %312 }
 0x495   :  { %v315_v47 = vadd.f32 %v313_v46, %v305_v45 }
 0x497   :  { %1226 = vtanh.f32 %v315_v47  ;;  %v410_v1 = vrot.slane %v315_v47, 6 }
 0x4a1   :  { %v1227_v48 = vpop.eup %1226 }
 0x4a2   :  { %318 = vrot.lane.b32.xlu0 %v1227_v48, %s1279_s28 }
 0x514   :  { %v319_v49 = vpop.permute.xlu0 %318 }
 0x515   :  { %v1383_v50 = vmul.f32 %v1225_v41, %v319_v49 }
 0x517   :  { %v323_v51 = vrot.slane %v1383_v50, 2 }
 0x519   :  { %324 = vrot.lane.b32.xlu1 %v323_v51, %s1280_s3 }
 0x58b   :  { %v325_v52 = vpop.permute.xlu1 %324 }
 0x58c   :  { %1101 = vmatmul.mubr.msk.f32.vlgmr.msra.gmra.mrb[2].mxu1 %vm117_vm3, %v325_v52 }
 0x58d   :  { %1184 = vmatpush3.bf16.msra.mxu1 %v1317_v4  ;;  %1122 = vmatprep.mubr.msk.f32.mxu1 %vm1277_vm2, %v1278_v8 }
 0x58e   :  { %1185 = vmatprep.subr.bf16.mxu1 %v1276_v0 }
 0x591   :  { %1187 = vmatpush3.bf16.msra.mxu1 %v1338_v10 }
 0x592   :  { %1194 = vmatprep.subr.bf16.mxu1 %v1276_v0 }
 0x65f   :  { %v394_v53 = vpop.f32.mrb[2].mxu1 }
 0x660   :  { %v399_v54 = vrot.slane %v394_v53, 4  ;;  %v1102_v55 = vpop.f32.mrb[3].mxu1 }
 0x662   :  { %v401_v56 = vadd.f32 %v399_v54, %v1362_v15 }
 0x664   :  { %1228 = vtanh.f32 %v401_v56  ;;  %v1010_v58 = vmul.f32 -1.442695, %v401_v56 }
 0x666   :  { %1230 = vpow2.f32 %v1010_v58 }
 0x66e   :  { %v1229_v57 = vpop.eup %1228 }
 0x66f   :  { %414 = vrot.lane.b32.xlu0 %v1229_v57, %s1279_s28 }
 0x670   :  { %v1231_v59 = vpop.eup %1230 }
 0x671   :  { %v405_v60 = vadd.f32 1.0, %v1231_v59 }
 0x673   :  { %1232 = vrcp.f32 %v405_v60 }
 0x67d   :  { %v1233_v61 = vpop.eup %1232 }
 0x67e   :  { %v412_v2 = vmul.f32 %v1233_v61, %v410_v1 }
 0x6e1   :  { %v415_v62 = vpop.permute.xlu0 %414 }
 0x6e2   :  { %v417_v63 = vmul.f32 %v1233_v61, %v415_v62 }
 0x6e4   :  { %419 = vrot.lane.b32.xlu1 %v417_v63, %s1280_s3 }
 0x756   :  { %v420_v3 = vpop.permute.xlu1 %419 }
 0x757   :  { %v422_v5 = vadd.f32 %v420_v3, %v412_v2 }
 0x759   :  { %1234 = vtanh.f32 %v422_v5  ;;  %v517_v26 = vrot.slane %v422_v5, 6 }
 0x763   :  { %v1235_v6 = vpop.eup %1234 }
 0x764   :  { %425 = vrot.lane.b32.xlu0 %v1235_v6, %s1279_s28 }
 0x7d6   :  { %v426_v7 = vpop.permute.xlu0 %425 }
 0x7d7   :  { %v1400_v9 = vmul.f32 %v1233_v61, %v426_v7 }
 0x7d9   :  { %v430_v11 = vrot.slane %v1400_v9, 4 }
 0x7db   :  { %431 = vrot.lane.b32.xlu1 %v430_v11, %s1280_s3 }
 0x84d   :  { %v432_v12 = vpop.permute.xlu1 %431 }
 0x84e   :  { %1112 = vmatmul.mubr.msk.f32.vlgmr.msra.gmra.mrb[4].mxu0 %vm117_vm3, %v432_v12 }
 0x84f   :  { %1190 = vmatpush3.bf16.msra.mxu0 %v1317_v4  ;;  %1133 = vmatprep.mubr.msk.f32.mxu0 %vm1277_vm2, %v1278_v8 }
 0x850   :  { %1191 = vmatprep.subr.bf16.mxu0 %v1276_v0 }
 0x853   :  { %1193 = vmatpush3.bf16.msra.mxu0 %v1338_v10 }
 0x854   :  { %1200 = vmatprep.subr.bf16.mxu0 %v1276_v0 }
 0x921   :  { %v501_v14 = vpop.f32.mrb[4].mxu0 }
 0x922   :  { %v506_v16 = vrot.slane %v501_v14, 2  ;;  %v1113_v17 = vpop.f32.mrb[5].mxu0 }
 0x924   :  { %v508_v18 = vadd.f32 %v506_v16, %v1362_v15 }
 0x926   :  { %1236 = vtanh.f32 %v508_v18  ;;  %v1012_v20 = vmul.f32 -1.442695, %v508_v18 }
 0x928   :  { %1238 = vpow2.f32 %v1012_v20 }
 0x930   :  { %v1237_v19 = vpop.eup %1236 }
 0x931   :  { %521 = vrot.lane.b32.xlu0 %v1237_v19, %s1279_s28 }
 0x932   :  { %v1239_v21 = vpop.eup %1238 }
 0x933   :  { %v512_v22 = vadd.f32 1.0, %v1239_v21 }
 0x935   :  { %1240 = vrcp.f32 %v512_v22 }
 0x93f   :  { %v1241_v23 = vpop.eup %1240 }
 0x940   :  { %v519_v27 = vmul.f32 %v1241_v23, %v517_v26 }
 0x9a3   :  { %v522_v24 = vpop.permute.xlu0 %521 }
 0x9a4   :  { %v524_v25 = vmul.f32 %v1241_v23, %v522_v24 }
 0x9a6   :  { %526 = vrot.lane.b32.xlu1 %v524_v25, %s1280_s3 }
 0xa18   :  { %v527_v28 = vpop.permute.xlu1 %526 }
 0xa19   :  { %v529_v29 = vadd.f32 %v527_v28, %v519_v27 }
 0xa1b   :  { %1242 = vtanh.f32 %v529_v29  ;;  %v621_v45 = vrot.slane %v529_v29, 6 }
 0xa25   :  { %v1243_v15 = vpop.eup %1242 }
 0xa26   :  { %532 = vrot.lane.b32.xlu0 %v1243_v15, %s1279_s28 }
 0xa98   :  { %v533_v30 = vpop.permute.xlu0 %532 }
 0xa99   :  { %v1417_v31 = vmul.f32 %v1241_v23, %v533_v30 }
 0xa9b   :  { %v537_v33 = vrot.slane %v1417_v31, 6 }
 0xa9d   :  { %538 = vrot.lane.b32.xlu1 %v537_v33, %s1280_s3 }
 0xb0f   :  { %v539_v34 = vpop.permute.xlu1 %538 }
 0xb10   :  { %1123 = vmatmul.mubr.msk.f32.vlgmr.msra.gmra.mrb[4].mxu1 %vm117_vm3, %v539_v34 }
 0xb11   :  { %1196 = vmatpush3.bf16.msra.mxu1 %v1317_v4  ;;  %1144 = vmatprep.mubr.msk.f32.mxu1 %vm1277_vm2, %v1278_v8 }
 0xb12   :  { %1197 = vmatprep.subr.bf16.mxu1 %v1276_v0 }
 0xb15   :  { %1199 = vmatpush3.bf16.msra.mxu1 %v1338_v10 }
 0xbe3   :  { %v608_v35 = vpop.f32.mrb[4].mxu1 }
 0xbe4   :  { %v612_v36 = vadd.f32 %v608_v35, %v1360_v13  ;;  %v1124_v37 = vpop.f32.mrb[5].mxu1 }
 0xbe6   :  { %1244 = vtanh.f32 %v612_v36  ;;  %v1014_v39 = vmul.f32 -1.442695, %v612_v36 }
 0xbe8   :  { %1246 = vpow2.f32 %v1014_v39 }
 0xbf0   :  { %v1245_v38 = vpop.eup %1244 }
 0xbf1   :  { %625 = vrot.lane.b32.xlu0 %v1245_v38, %s1279_s28 }
 0xbf2   :  { %v1247_v40 = vpop.eup %1246 }
 0xbf3   :  { %v616_v41 = vadd.f32 1.0, %v1247_v40 }
 0xbf5   :  { %1248 = vrcp.f32 %v616_v41 }
 0xbff   :  { %v1249_v42 = vpop.eup %1248 }
 0xc00   :  { %v623_v46 = vmul.f32 %v1249_v42, %v621_v45 }
 0xc63   :  { %v626_v43 = vpop.permute.xlu0 %625 }
 0xc64   :  { %v628_v44 = vmul.f32 %v1249_v42, %v626_v43 }
 0xc66   :  { %630 = vrot.lane.b32.xlu1 %v628_v44, %s1280_s3 }
 0xcd8   :  { %v631_v47 = vpop.permute.xlu1 %630 }
 0xcd9   :  { %v633_v48 = vadd.f32 %v631_v47, %v623_v46 }
 0xcdb   :  { %1250 = vtanh.f32 %v633_v48 }
 0xce5   :  { %v1251_v49 = vpop.eup %1250 }
 0xce6   :  { %636 = vrot.lane.b32.xlu0 %v1251_v49, %s1279_s28 }
 0xd58   :  { %v637_v52 = vpop.permute.xlu0 %636 }
 0xd59   :  { %v639_v53 = vmul.f32 %v1249_v42, %v637_v52 }
 0xd5b   :  { %641 = vrot.lane.b32.xlu1 %v639_v53, %s1280_s3 }
 0xdcd   :  { %v1434_v54 = vpop.permute.xlu1 %641 }
 0xdce   :  { %1134 = vmatmul.mubr.msk.f32.vlgmr.msra.gmra.mrb[6].mxu0 %vm117_vm3, %v1434_v54 }
 0xdcf   :  { %1202 = vmatpush3.bf16.msra.mxu0 %v1317_v4  ;;  %1155 = vmatprep.mubr.msk.f32.mxu0 %vm1277_vm2, %v1278_v8 }
 0xdd0   :  { %1203 = vmatprep.subr.bf16.mxu0 %v1276_v0  ;;  %v727_v0 = vrot.slane %v633_v48, 6 }
 0xdd3   :  { %1205 = vmatpush3.bf16.msra.mxu0 %v1338_v10 }
 0xea1   :  { %v711_v55 = vpop.f32.mrb[6].mxu0 }
 0xea2   :  { %v716_v56 = vrot.slane %v711_v55, 6  ;;  %v1135_v57 = vpop.f32.mrb[7].mxu0 }
 0xea4   :  { %v718_v58 = vadd.f32 %v716_v56, %v1360_v13 }
 0xea6   :  { %1252 = vtanh.f32 %v718_v58  ;;  %v1016_v60 = vmul.f32 -1.442695, %v718_v58 }
 0xea8   :  { %1254 = vpow2.f32 %v1016_v60 }
 0xeb0   :  { %v1253_v59 = vpop.eup %1252 }
 0xeb1   :  { %731 = vrot.lane.b32.xlu0 %v1253_v59, %s1279_s28 }
 0xeb2   :  { %v1255_v61 = vpop.eup %1254 }
 0xeb3   :  { %v722_v4 = vadd.f32 1.0, %v1255_v61 }
 0xeb5   :  { %1256 = vrcp.f32 %v722_v4 }
 0xebf   :  { %v1257_v62 = vpop.eup %1256 }
 0xec0   :  { %v729_v10 = vmul.f32 %v1257_v62, %v727_v0 }
 0xf23   :  { %v732_v8 = vpop.permute.xlu0 %731 }
 0xf24   :  { %v734_v63 = vmul.f32 %v1257_v62, %v732_v8 }
 0xf26   :  { %736 = vrot.lane.b32.xlu1 %v734_v63, %s1280_s3 }
 0xf98   :  { %v737_v1 = vpop.permute.xlu1 %736 }
 0xf99   :  { %v739_v2 = vadd.f32 %v737_v1, %v729_v10 }
 0xf9b   :  { %1258 = vtanh.f32 %v739_v2  ;;  %v834_v26 = vrot.slane %v739_v2, 6 }
 0xfa5   :  { %v1259_v3 = vpop.eup %1258 }
 0xfa6   :  { %742 = vrot.lane.b32.xlu0 %v1259_v3, %s1279_s28 }
0x1018   :  { %v743_v5 = vpop.permute.xlu0 %742 }
0x1019   :  { %v745_v6 = vmul.f32 %v1257_v62, %v743_v5 }
0x101b   :  { %v747_v7 = vrot.slane %v745_v6, 2 }
0x101d   :  { %748 = vrot.lane.b32.xlu1 %v747_v7, %s1280_s3 }
0x108f   :  { %v749_v12 = vpop.permute.xlu1 %748 }
0x1090   :  { %1145 = vmatmul.mubr.msk.f32.vlgmr.msra.gmra.mrb[6].mxu1 %vm117_vm3, %v749_v12 }
0x1163   :  { %v818_v14 = vpop.f32.mrb[6].mxu1 }
0x1164   :  { %v823_v16 = vrot.slane %v818_v14, 4  ;;  %v1146_v17 = vpop.f32.mrb[7].mxu1 }
0x1166   :  { %v825_v18 = vadd.f32 %v823_v16, %v1360_v13 }
0x1168   :  { %1260 = vtanh.f32 %v825_v18  ;;  %v1018_v20 = vmul.f32 -1.442695, %v825_v18 }
0x116a   :  { %1262 = vpow2.f32 %v1018_v20 }
0x1172   :  { %v1261_v19 = vpop.eup %1260 }
0x1173   :  { %838 = vrot.lane.b32.xlu0 %v1261_v19, %s1279_s28 }
0x1174   :  { %v1263_v21 = vpop.eup %1262 }
0x1175   :  { %v829_v22 = vadd.f32 1.0, %v1263_v21 }
0x1177   :  { %1264 = vrcp.f32 %v829_v22 }
0x1181   :  { %v1265_v23 = vpop.eup %1264 }
0x1182   :  { %v836_v27 = vmul.f32 %v1265_v23, %v834_v26 }
0x11e5   :  { %v839_v24 = vpop.permute.xlu0 %838 }
0x11e6   :  { %v841_v25 = vmul.f32 %v1265_v23, %v839_v24 }
0x11e8   :  { %843 = vrot.lane.b32.xlu1 %v841_v25, %s1280_s3 }
0x125a   :  { %v844_v28 = vpop.permute.xlu1 %843 }
0x125b   :  { %v846_v29 = vadd.f32 %v844_v28, %v836_v27 }
0x125d   :  { %1266 = vtanh.f32 %v846_v29 }
0x1267   :  { %v1267_v15 = vpop.eup %1266 }
0x1268   :  { %849 = vrot.lane.b32.xlu0 %v1267_v15, %s1279_s28 }
0x12da   :  { %v850_v30 = vpop.permute.xlu0 %849 }
0x12db   :  { %v852_v34 = vmul.f32 %v1265_v23, %v850_v30 }
0x12dd   :  { %v854_v35 = vrot.slane %v852_v34, 4 }
0x12df   :  { %855 = vrot.lane.b32.xlu1 %v854_v35, %s1280_s3 }
0x1351   :  { %v856_v36 = vpop.permute.xlu1 %855 }
0x1352   :  { %1156 = vmatmul.mubr.msk.f32.vlgmr.msra.gmra.mrb[8].mxu0 %vm117_vm3, %v856_v36 }
0x1425   :  { %v925_v37 = vpop.f32.mrb[8].mxu0 }
0x1426   :  { %v930_v38 = vrot.slane %v925_v37, 2  ;;  %v1157_v39 = vpop.f32.mrb[9].mxu0 }
0x1428   :  { %v932_v40 = vadd.f32 %v930_v38, %v1360_v13  ;;  %v941_v13 = vrot.slane %v846_v29, 6 }
0x142a   :  { %1268 = vtanh.f32 %v932_v40  ;;  %v1020_v42 = vmul.f32 -1.442695, %v932_v40 }
0x142c   :  { %1270 = vpow2.f32 %v1020_v42 }
0x1434   :  { %v1269_v41 = vpop.eup %1268 }
0x1435   :  { %945 = vrot.lane.b32.xlu0 %v1269_v41, %s1279_s28 }
0x1436   :  { %v1271_v43 = vpop.eup %1270 }
0x1437   :  { %v936_v44 = vadd.f32 1.0, %v1271_v43 }
0x1439   :  { %969 = vrot.lane.b32.xlu0 %v747_v7, %s1279_s28  ;;  %1272 = vrcp.f32 %v936_v44 }
0x1443   :  { %v1273_v45 = vpop.eup %1272 }
0x1444   :  { %v943_v48 = vmul.f32 %v1273_v45, %v941_v13 }
0x14a7   :  { %v946_v46 = vpop.permute.xlu0 %945 }
0x14a8   :  { %v948_v47 = vmul.f32 %v1273_v45, %v946_v46 }
0x14aa   :  { %950 = vrot.lane.b32.xlu1 %v948_v47, %s1280_s3 }
0x14ab   :  { %v970_v56 = vpop.permute.xlu0 %969 }
0x14ac   :  { %v983_v59 = vsel %vm117_vm3, %v1434_v54, %v970_v56 }
0x14ae   :  { %961 = vrot.lane.b32.xlu1 %v323_v51, %s1279_s28 }
0x14b2   :  { %964 = vrot.lane.b32.xlu1 %v430_v11, %s1281_s29 }
0x151c   :  { %v951_v49 = vpop.permute.xlu1 %950 }
0x151d   :  { %v953_v52 = vadd.f32 %v951_v49, %v943_v48 }
0x151f   :  { %1274 = vtanh.f32 %v953_v52 }
0x1520   :  { %v962_v55 = vpop.permute.xlu1 %961 }
0x1521   :  { %v978_v51 = vsel %vm117_vm3, %v1369_v32, %v962_v55 }
0x1524   :  { %v965_v57 = vpop.permute.xlu1 %964 }
0x1525   :  { %v980_v9 = vsel %vm979_vm4, %v978_v51, %v965_v57 }
0x1526   :  { %v982_v4 = vsel %vm981_vm5, %v980_v9, %v537_v33 }
0x1529   :  { %v1275_v53 = vpop.eup %1274 }
0x152a   :  { %956 = vrot.lane.b32.xlu0 %v1275_v53, %s1279_s28 }
0x152e   :  { %972 = vrot.lane.b32.xlu0 %v854_v35, %s1281_s29 }
0x159c   :  { %v957_v58 = vpop.permute.xlu0 %956 }
0x159d   :  { %v959_v50 = vmul.f32 %v1273_v45, %v957_v58 }
0x159f   :  { %v976_v11 = vrot.slane %v959_v50, 6 }
0x15a0   :  { %v973_v60 = vpop.permute.xlu0 %972 }
0x15a1   :  { %v984_v61 = vsel %vm979_vm4, %v983_v59, %v973_v60 }
0x15a2   :  { %v985_v62 = vsel %vm981_vm5, %v984_v61, %v976_v11 }
0x15a3   :  { %v988_v8 = vcombine.low %v982_v4, %v985_v62 }
0x15a5   :  { %1021 = vst.sshfl [vmem:[%s1478_s4] sm:$0x33 pattern:$0x76325410] %v988_v8 }

</bundles_post_ra>
